<compile_context>
chip_gen: v7x
topology: tpu7x:2x2x1
jax: 0.10.0
libtpu: 0.0.40
codegen_flags: <defaults>
</compile_context>

<pallas_src>
import functools

import numpy as np
import jax
import jax.numpy as jnp
from jax.experimental import pallas as pl
from jax.experimental.pallas import tpu as pltpu

_HIGHEST = jax.lax.Precision.HIGHEST

# Non-center 3x3 taps as (dh, dw) offsets; tap index in the weight = (dh+1)*3+(dw+1).
_TAPS = ((-1, -1), (-1, 0), (-1, 1), (0, -1), (0, 1), (1, -1), (1, 0), (1, 1))


def _round_up(x, m):
    return (x + m - 1) // m * m


def _border_masks(H, W):
    """(8, H*W) float32 validity masks (1.0 where the shifted source pixel is
    inside the image) for the 8 non-center 3x3 taps, in _TAPS order."""
    h = np.repeat(np.arange(H), W)
    w = np.tile(np.arange(W), H)
    rows = []
    for dr, dc in _TAPS:
        valid = (h + dr >= 0) & (h + dr < H) & (w + dc >= 0) & (w + dc < W)
        rows.append(valid.astype(np.float32))
    return np.stack(rows)


def _building_block_kernel(x_ref, w1_ref, b1_ref, a1_ref,
                           dwc_ref, mdw_ref, b2_ref, a2_ref,
                           w2_ref, b3_ref, out_ref, *, W, residual, cout):
    """One grid step processes `batch_block` images in (C, batch_block*H*W) layout."""
    LB = x_ref.shape[1]
    x = x_ref[...]                                           # (cin_p, LB) f32

    # ---- 1x1 pointwise conv #1 (BN scale folded into w1) on the MXU ----
    t1 = jnp.dot(w1_ref[...], x, preferred_element_type=jnp.float32)   # (mid_p, LB)
    t1 = t1 + b1_ref[...]                                    # folded BN bias
    t1 = jnp.where(t1 >= 0, t1, a1_ref[...] * t1)            # PReLU (per channel)

    # ---- 3x3 depthwise conv, padding=1, stride=1: XLU rolls + mask*weight table ----
    acc = t1 * dwc_ref[...]                                  # center tap (always valid)
    for j, (dr, dc) in enumerate(_TAPS):
        shift = (-(dr * W + dc)) % LB                        # out[p] = in[p + dr*W + dc]
        tap = pltpu.roll(t1, shift=shift, axis=1)
        acc = acc + tap * mdw_ref[j]                         # (mid_p,LB) * (mid_p,LB)
    t2 = acc + b2_ref[...]                                   # folded BN bias
    t2 = jnp.where(t2 >= 0, t2, a2_ref[...] * t2)            # PReLU

    # ---- 1x1 pointwise conv #2 (BN scale folded into w2) on the MXU ----
    o = jnp.dot(w2_ref[...], t2, preferred_element_type=jnp.float32)   # (cout_p, LB)
    o = o + b3_ref[...]
    o = o[:cout, :]
    if residual:
        o = o + x[:cout, :]                                  # downsample path
    out_ref[...] = o.astype(out_ref.dtype)


def building_block_forward(x_nchw, params, *, residual=True, batch_block=None):
    N, cin, H, W = x_nchw.shape
    HW = H * W
    if batch_block is None:
        batch_block = N                       # fold the whole batch into lanes
    assert N % batch_block == 0
    LB = batch_block * HW
    num_steps = N // batch_block

    mid = params["w1"].shape[1]
    cout = params["w2"].shape[1]
    cin_p = _round_up(cin, 8)
    mid_p = _round_up(mid, 8)
    cout_p = _round_up(cout, 8)

    # Channels on sublanes, batch folded into lanes: (cin_p, N*HW).
    x_cl = jnp.transpose(x_nchw.reshape(N, cin, HW), (1, 0, 2)).reshape(cin, N * HW)
    x_cl = jnp.pad(x_cl, ((0, cin_p - cin), (0, 0)))

    # Fold eval-mode BN scales into conv weights; transpose for jnp.dot; zero-pad.
    w1k = jnp.pad((params["w1"] * params["s1"][None, :]).T,
                  ((0, mid_p - mid), (0, cin_p - cin)))                 # (mid_p, cin_p)
    w2k = jnp.pad((params["w2"] * params["s3"][None, :]).T,
                  ((0, cout_p - cout), (0, mid_p - mid)))               # (cout_p, mid_p)

    dws = (params["dw"] * params["s2"][None, None, :]).reshape(9, mid)  # (9, mid)
    dwc = jnp.pad(dws[4][:, None], ((0, mid_p - mid), (0, 0)))          # (mid_p, 1)

    # Per-tap (mask x folded weight) table, tiled over the images in one step.
    masks = jnp.asarray(_border_masks(H, W))                            # (8, HW)
    mdw = jnp.stack([dws[(dr + 1) * 3 + (dc + 1)][:, None] * masks[j][None, :]
                     for j, (dr, dc) in enumerate(_TAPS)])              # (8, mid, HW)
    mdw = jnp.pad(mdw, ((0, 0), (0, mid_p - mid), (0, 0)))
    mdw = jnp.tile(mdw, (1, 1, batch_block))                            # (8, mid_p, LB)

    def col(v, cp):
        return jnp.pad(v[:, None], ((0, cp - v.shape[0]), (0, 0)))

    b1k = col(params["b1"], mid_p)
    a1k = col(params["a1"], mid_p)
    b2k = col(params["b2"], mid_p)
    a2k = col(params["a2"], mid_p)
    b3k = col(params["b3"], cout_p)

    kernel = functools.partial(_building_block_kernel, W=W,
                               residual=residual, cout=cout)

    def const(shape):
        return pl.BlockSpec(shape, lambda i: (0,) * len(shape))

    grid_spec = pltpu.PrefetchScalarGridSpec(
        num_scalar_prefetch=0,
        grid=(num_steps,),
        in_specs=[
            pl.BlockSpec((cin_p, LB), lambda i: (0, i)),   # x
            const((mid_p, cin_p)),                         # w1 (BN folded, transposed)
            const((mid_p, 1)),                             # b1
            const((mid_p, 1)),                             # a1 (PReLU)
            const((mid_p, 1)),                             # dw center tap
            const((8, mid_p, LB)),                         # mask*weight depthwise table
            const((mid_p, 1)),                             # b2
            const((mid_p, 1)),                             # a2 (PReLU)
            const((cout_p, mid_p)),                        # w2 (BN folded, transposed)
            const((cout_p, 1)),                            # b3
        ],
        out_specs=pl.BlockSpec((cout, LB), lambda i: (0, i)),
    )

    flops = 2 * N * HW * (cin * mid + 9 * mid + mid * cout)
    in_bytes = 4 * (x_cl.size + w1k.size + w2k.size + mdw.size + dwc.size +
                    b1k.size + a1k.size + b2k.size + a2k.size + b3k.size)
    out_bytes = 4 * cout * N * HW
    cost = pl.CostEstimate(flops=int(flops), transcendentals=0,
                           bytes_accessed=int(in_bytes + out_bytes))

    out_flat = pl.pallas_call(
        kernel,
        out_shape=jax.ShapeDtypeStruct((cout, N * HW), jnp.float32),
        grid_spec=grid_spec,
        compiler_params=pltpu.CompilerParams(
            dimension_semantics=("parallel",)),
        cost_estimate=cost,
    )(x_cl, w1k, b1k, a1k, dwc, mdw, b2k, a2k, w2k, b3k)

    return jnp.transpose(out_flat.reshape(cout, N, H, W), (1, 0, 2, 3))


def reference_forward(x_nchw, params, *, residual=True):
    """Pure-JAX f32 reference in NCHW (eval-mode BN), faithful to the module."""
    t = jnp.einsum("nchw,cm->nmhw", x_nchw, params["w1"], precision=_HIGHEST)
    t = t * params["s1"][None, :, None, None] + params["b1"][None, :, None, None]
    t = jnp.where(t >= 0, t, params["a1"][None, :, None, None] * t)

    dw_oihw = jnp.transpose(params["dw"], (2, 0, 1))[:, None, :, :]   # (mid,1,3,3)
    t2 = jax.lax.conv_general_dilated(
        t, dw_oihw, window_strides=(1, 1), padding=((1, 1), (1, 1)),
        dimension_numbers=("NCHW", "OIHW", "NCHW"),
        feature_group_count=t.shape[1], precision=_HIGHEST)
    t2 = t2 * params["s2"][None, :, None, None] + params["b2"][None, :, None, None]
    t2 = jnp.where(t2 >= 0, t2, params["a2"][None, :, None, None] * t2)

    o = jnp.einsum("nmhw,mo->nohw", t2, params["w2"], precision=_HIGHEST)
    o = o * params["s3"][None, :, None, None] + params["b3"][None, :, None, None]
    if residual:
        o = o + x_nchw
    return o


def _fold_bn(kg, kb, km, kv, c, eps=1e-5):
    gamma = jax.random.uniform(kg, (c,), jnp.float32, 0.5, 1.5)
    beta = 0.1 * jax.random.normal(kb, (c,), jnp.float32)
    mean = 0.1 * jax.random.normal(km, (c,), jnp.float32)
    var = jax.random.uniform(kv, (c,), jnp.float32, 0.5, 1.5)
    scale = gamma / jnp.sqrt(var + eps)
    bias = beta - mean * scale
    return scale, bias


if __name__ == "__main__":
    # Module config: BuildingBlock(inp=4, outp=4, r=2, stride=1, attention=None)
    inp, outp, r = 4, 4, 2
    mid = outp * r
    N, H, W = 2, 16, 16

    key = jax.random.PRNGKey(0)
    ks = jax.random.split(key, 18)

    x_nchw = jax.random.normal(ks[0], (N, inp, H, W), jnp.float32)

    s1, b1 = _fold_bn(ks[4], ks[5], ks[6], ks[7], mid)
    s2, b2 = _fold_bn(ks[8], ks[9], ks[10], ks[11], mid)
    s3, b3 = _fold_bn(ks[12], ks[13], ks[14], ks[15], outp)

    params = {
        "w1": 0.3 * jax.random.normal(ks[1], (inp, mid), jnp.float32),
        "dw": 0.3 * jax.random.normal(ks[2], (3, 3, mid), jnp.float32),
        "w2": 0.3 * jax.random.normal(ks[3], (mid, outp), jnp.float32),
        "s1": s1, "b1": b1,
        "s2": s2, "b2": b2,
        "s3": s3, "b3": b3,
        "a1": 0.25 + 0.05 * jax.random.normal(ks[16], (mid,), jnp.float32),
        "a2": 0.25 + 0.05 * jax.random.normal(ks[17], (mid,), jnp.float32),
    }

    # downsample (residual add) is active: stride == 1 and inp == outp.
    out = jax.block_until_ready(
        building_block_forward(x_nchw, params, residual=True))
    ref = reference_forward(x_nchw, params, residual=True)

    assert out.shape == (N, outp, H, W), out.shape
    max_err = float(jnp.max(jnp.abs(out - ref)))
    if max_err < 5e-3:
        print("KERNEL_OK")
    else:
        print(f"MISMATCH max_abs_err={max_err}")
</pallas_src>

<mosaic_0001>
module attributes {stable_mosaic.version = 11 : i64} {
  func.func @_building_block_kernel(%arg0: i32, %arg1: memref<8x512xf32, #tpu.memory_space<vmem>>, %arg2: memref<8x8xf32, #tpu.memory_space<vmem>>, %arg3: memref<8x1xf32, #tpu.memory_space<vmem>>, %arg4: memref<8x1xf32, #tpu.memory_space<vmem>>, %arg5: memref<8x1xf32, #tpu.memory_space<vmem>>, %arg6: memref<8x8x512xf32, #tpu.memory_space<vmem>>, %arg7: memref<8x1xf32, #tpu.memory_space<vmem>>, %arg8: memref<8x1xf32, #tpu.memory_space<vmem>>, %arg9: memref<8x8xf32, #tpu.memory_space<vmem>>, %arg10: memref<8x1xf32, #tpu.memory_space<vmem>>, %arg11: memref<4x512xf32, #tpu.memory_space<vmem>>) attributes {dimension_semantics = [#tpu.dimension_semantics<parallel>], iteration_bounds = array<i64: 1>, scalar_prefetch = 0 : i64, scratch_operands = 0 : i64, tpu.core_type = #tpu.core_type<tc>, window_params = [{transform_indices = @transform_0, window_bounds = array<i64: 8, 512>}, {pipeline_mode = #tpu.pipeline_mode<synchronous>, transform_indices = @transform_1, window_bounds = array<i64: 8, 8>}, {pipeline_mode = #tpu.pipeline_mode<synchronous>, transform_indices = @transform_2, window_bounds = array<i64: 8, 1>}, {pipeline_mode = #tpu.pipeline_mode<synchronous>, transform_indices = @transform_3, window_bounds = array<i64: 8, 1>}, {pipeline_mode = #tpu.pipeline_mode<synchronous>, transform_indices = @transform_4, window_bounds = array<i64: 8, 1>}, {pipeline_mode = #tpu.pipeline_mode<synchronous>, transform_indices = @transform_5, window_bounds = array<i64: 8, 8, 512>}, {pipeline_mode = #tpu.pipeline_mode<synchronous>, transform_indices = @transform_6, window_bounds = array<i64: 8, 1>}, {pipeline_mode = #tpu.pipeline_mode<synchronous>, transform_indices = @transform_7, window_bounds = array<i64: 8, 1>}, {pipeline_mode = #tpu.pipeline_mode<synchronous>, transform_indices = @transform_8, window_bounds = array<i64: 8, 8>}, {pipeline_mode = #tpu.pipeline_mode<synchronous>, transform_indices = @transform_9, window_bounds = array<i64: 8, 1>}, {transform_indices = @transform_10, window_bounds = array<i64: 4, 512>}]} {
    %c0 = arith.constant 0 : index
    %c0_0 = arith.constant 0 : index
    %0 = vector.load %arg1[%c0, %c0_0] : memref<8x512xf32, #tpu.memory_space<vmem>>, vector<8x512xf32>
    %c0_1 = arith.constant 0 : index
    %c0_2 = arith.constant 0 : index
    %1 = vector.load %arg2[%c0_1, %c0_2] : memref<8x8xf32, #tpu.memory_space<vmem>>, vector<8x8xf32>
    %cst = arith.constant dense<0.000000e+00> : vector<8x512xf32>
    %2 = tpu.matmul %1, %0, %cst {dimension_numbers = #tpu.dot_dimension_numbers<[1], [0], [0], [1], [0, 0, 1, 1], [], []>} : vector<8x8xf32>, vector<8x512xf32>, vector<8x512xf32> -> vector<8x512xf32>
    %c0_3 = arith.constant 0 : index
    %c0_4 = arith.constant 0 : index
    %3 = vector.load %arg3[%c0_3, %c0_4] : memref<8x1xf32, #tpu.memory_space<vmem>>, vector<8x1xf32>
    %4 = vector.broadcast %3 : vector<8x1xf32> to vector<8x512xf32>
    %5 = arith.addf %2, %4 : vector<8x512xf32>
    %cst_5 = arith.constant 0.000000e+00 : f32
    %6 = vector.broadcast %cst_5 : f32 to vector<8x512xf32>
    %7 = arith.cmpf oge, %5, %6 : vector<8x512xf32>
    %c0_6 = arith.constant 0 : index
    %c0_7 = arith.constant 0 : index
    %8 = vector.load %arg4[%c0_6, %c0_7] : memref<8x1xf32, #tpu.memory_space<vmem>>, vector<8x1xf32>
    %9 = vector.broadcast %8 : vector<8x1xf32> to vector<8x512xf32>
    %10 = arith.mulf %9, %5 : vector<8x512xf32>
    %11 = arith.select %7, %5, %10 : vector<8x512xi1>, vector<8x512xf32>
    %c0_8 = arith.constant 0 : index
    %c0_9 = arith.constant 0 : index
    %12 = vector.load %arg5[%c0_8, %c0_9] : memref<8x1xf32, #tpu.memory_space<vmem>>, vector<8x1xf32>
    %13 = vector.broadcast %12 : vector<8x1xf32> to vector<8x512xf32>
    %14 = arith.mulf %11, %13 : vector<8x512xf32>
    %c17_i32 = arith.constant 17 : i32
    %15 = tpu.dynamic_rotate %11 by %c17_i32 dim 1 : vector<8x512xf32>, i32 -> vector<8x512xf32>
    %c0_10 = arith.constant 0 : index
    %c0_11 = arith.constant 0 : index
    %c0_12 = arith.constant 0 : index
    %16 = vector.load %arg6[%c0_10, %c0_11, %c0_12] : memref<8x8x512xf32, #tpu.memory_space<vmem>>, vector<1x8x512xf32>
    %17 = vector.shape_cast %16 : vector<1x8x512xf32> to vector<8x512xf32>
    %18 = arith.mulf %15, %17 : vector<8x512xf32>
    %19 = arith.addf %14, %18 : vector<8x512xf32>
    %c16_i32 = arith.constant 16 : i32
    %20 = tpu.dynamic_rotate %11 by %c16_i32 dim 1 : vector<8x512xf32>, i32 -> vector<8x512xf32>
    %c1 = arith.constant 1 : index
    %c0_13 = arith.constant 0 : index
    %c0_14 = arith.constant 0 : index
    %21 = vector.load %arg6[%c1, %c0_13, %c0_14] : memref<8x8x512xf32, #tpu.memory_space<vmem>>, vector<1x8x512xf32>
    %22 = vector.shape_cast %21 : vector<1x8x512xf32> to vector<8x512xf32>
    %23 = arith.mulf %20, %22 : vector<8x512xf32>
    %24 = arith.addf %19, %23 : vector<8x512xf32>
    %c15_i32 = arith.constant 15 : i32
    %25 = tpu.dynamic_rotate %11 by %c15_i32 dim 1 : vector<8x512xf32>, i32 -> vector<8x512xf32>
    %c2 = arith.constant 2 : index
    %c0_15 = arith.constant 0 : index
    %c0_16 = arith.constant 0 : index
    %26 = vector.load %arg6[%c2, %c0_15, %c0_16] : memref<8x8x512xf32, #tpu.memory_space<vmem>>, vector<1x8x512xf32>
    %27 = vector.shape_cast %26 : vector<1x8x512xf32> to vector<8x512xf32>
    %28 = arith.mulf %25, %27 : vector<8x512xf32>
    %29 = arith.addf %24, %28 : vector<8x512xf32>
    %c1_i32 = arith.constant 1 : i32
    %30 = tpu.dynamic_rotate %11 by %c1_i32 dim 1 : vector<8x512xf32>, i32 -> vector<8x512xf32>
    %c3 = arith.constant 3 : index
    %c0_17 = arith.constant 0 : index
    %c0_18 = arith.constant 0 : index
    %31 = vector.load %arg6[%c3, %c0_17, %c0_18] : memref<8x8x512xf32, #tpu.memory_space<vmem>>, vector<1x8x512xf32>
    %32 = vector.shape_cast %31 : vector<1x8x512xf32> to vector<8x512xf32>
    %33 = arith.mulf %30, %32 : vector<8x512xf32>
    %34 = arith.addf %29, %33 : vector<8x512xf32>
    %c511_i32 = arith.constant 511 : i32
    %35 = tpu.dynamic_rotate %11 by %c511_i32 dim 1 : vector<8x512xf32>, i32 -> vector<8x512xf32>
    %c4 = arith.constant 4 : index
    %c0_19 = arith.constant 0 : index
    %c0_20 = arith.constant 0 : index
    %36 = vector.load %arg6[%c4, %c0_19, %c0_20] : memref<8x8x512xf32, #tpu.memory_space<vmem>>, vector<1x8x512xf32>
    %37 = vector.shape_cast %36 : vector<1x8x512xf32> to vector<8x512xf32>
    %38 = arith.mulf %35, %37 : vector<8x512xf32>
    %39 = arith.addf %34, %38 : vector<8x512xf32>
    %c497_i32 = arith.constant 497 : i32
    %40 = tpu.dynamic_rotate %11 by %c497_i32 dim 1 : vector<8x512xf32>, i32 -> vector<8x512xf32>
    %c5 = arith.constant 5 : index
    %c0_21 = arith.constant 0 : index
    %c0_22 = arith.constant 0 : index
    %41 = vector.load %arg6[%c5, %c0_21, %c0_22] : memref<8x8x512xf32, #tpu.memory_space<vmem>>, vector<1x8x512xf32>
    %42 = vector.shape_cast %41 : vector<1x8x512xf32> to vector<8x512xf32>
    %43 = arith.mulf %40, %42 : vector<8x512xf32>
    %44 = arith.addf %39, %43 : vector<8x512xf32>
    %c496_i32 = arith.constant 496 : i32
    %45 = tpu.dynamic_rotate %11 by %c496_i32 dim 1 : vector<8x512xf32>, i32 -> vector<8x512xf32>
    %c6 = arith.constant 6 : index
    %c0_23 = arith.constant 0 : index
    %c0_24 = arith.constant 0 : index
    %46 = vector.load %arg6[%c6, %c0_23, %c0_24] : memref<8x8x512xf32, #tpu.memory_space<vmem>>, vector<1x8x512xf32>
    %47 = vector.shape_cast %46 : vector<1x8x512xf32> to vector<8x512xf32>
    %48 = arith.mulf %45, %47 : vector<8x512xf32>
    %49 = arith.addf %44, %48 : vector<8x512xf32>
    %c495_i32 = arith.constant 495 : i32
    %50 = tpu.dynamic_rotate %11 by %c495_i32 dim 1 : vector<8x512xf32>, i32 -> vector<8x512xf32>
    %c7 = arith.constant 7 : index
    %c0_25 = arith.constant 0 : index
    %c0_26 = arith.constant 0 : index
    %51 = vector.load %arg6[%c7, %c0_25, %c0_26] : memref<8x8x512xf32, #tpu.memory_space<vmem>>, vector<1x8x512xf32>
    %52 = vector.shape_cast %51 : vector<1x8x512xf32> to vector<8x512xf32>
    %53 = arith.mulf %50, %52 : vector<8x512xf32>
    %54 = arith.addf %49, %53 : vector<8x512xf32>
    %c0_27 = arith.constant 0 : index
    %c0_28 = arith.constant 0 : index
    %55 = vector.load %arg7[%c0_27, %c0_28] : memref<8x1xf32, #tpu.memory_space<vmem>>, vector<8x1xf32>
    %56 = vector.broadcast %55 : vector<8x1xf32> to vector<8x512xf32>
    %57 = arith.addf %54, %56 : vector<8x512xf32>
    %cst_29 = arith.constant 0.000000e+00 : f32
    %58 = vector.broadcast %cst_29 : f32 to vector<8x512xf32>
    %59 = arith.cmpf oge, %57, %58 : vector<8x512xf32>
    %c0_30 = arith.constant 0 : index
    %c0_31 = arith.constant 0 : index
    %60 = vector.load %arg8[%c0_30, %c0_31] : memref<8x1xf32, #tpu.memory_space<vmem>>, vector<8x1xf32>
    %61 = vector.broadcast %60 : vector<8x1xf32> to vector<8x512xf32>
    %62 = arith.mulf %61, %57 : vector<8x512xf32>
    %63 = arith.select %59, %57, %62 : vector<8x512xi1>, vector<8x512xf32>
    %c0_32 = arith.constant 0 : index
    %c0_33 = arith.constant 0 : index
    %64 = vector.load %arg9[%c0_32, %c0_33] : memref<8x8xf32, #tpu.memory_space<vmem>>, vector<8x8xf32>
    %cst_34 = arith.constant dense<0.000000e+00> : vector<8x512xf32>
    %65 = tpu.matmul %64, %63, %cst_34 {dimension_numbers = #tpu.dot_dimension_numbers<[1], [0], [0], [1], [0, 0, 1, 1], [], []>} : vector<8x8xf32>, vector<8x512xf32>, vector<8x512xf32> -> vector<8x512xf32>
    %c0_35 = arith.constant 0 : index
    %c0_36 = arith.constant 0 : index
    %66 = vector.load %arg10[%c0_35, %c0_36] : memref<8x1xf32, #tpu.memory_space<vmem>>, vector<8x1xf32>
    %67 = vector.broadcast %66 : vector<8x1xf32> to vector<8x512xf32>
    %68 = arith.addf %65, %67 : vector<8x512xf32>
    %69 = vector.extract_strided_slice %68 {offsets = [0, 0], sizes = [4, 512], strides = [1, 1]} : vector<8x512xf32> to vector<4x512xf32>
    %70 = vector.extract_strided_slice %0 {offsets = [0, 0], sizes = [4, 512], strides = [1, 1]} : vector<8x512xf32> to vector<4x512xf32>
    %71 = arith.addf %69, %70 : vector<4x512xf32>
    %c0_37 = arith.constant 0 : index
    %c0_38 = arith.constant 0 : index
    %72 = vector.load %arg11[%c0_37, %c0_38] : memref<4x512xf32, #tpu.memory_space<vmem>>, vector<4x512xf32>
    tpu.vector_store %arg11[%c0_37, %c0_38], %71 {strides = array<i32>} : memref<4x512xf32, #tpu.memory_space<vmem>>, vector<4x512xf32>,
    return
  }
  func.func @transform_0(%arg0: i32) -> (i32, i32) {
    %c0_i32 = arith.constant 0 : i32
    %c0_i32_0 = arith.constant 0 : i32
    return %c0_i32, %arg0 : i32, i32
  }
  func.func @transform_1(%arg0: i32) -> (i32, i32) {
    %c0_i32 = arith.constant 0 : i32
    %c0_i32_0 = arith.constant 0 : i32
    %c0_i32_1 = arith.constant 0 : i32
    return %c0_i32, %c0_i32_0 : i32, i32
  }
  func.func @transform_2(%arg0: i32) -> (i32, i32) {
    %c0_i32 = arith.constant 0 : i32
    %c0_i32_0 = arith.constant 0 : i32
    %c0_i32_1 = arith.constant 0 : i32
    return %c0_i32, %c0_i32_0 : i32, i32
  }
  func.func @transform_3(%arg0: i32) -> (i32, i32) {
    %c0_i32 = arith.constant 0 : i32
    %c0_i32_0 = arith.constant 0 : i32
    %c0_i32_1 = arith.constant 0 : i32
    return %c0_i32, %c0_i32_0 : i32, i32
  }
  func.func @transform_4(%arg0: i32) -> (i32, i32) {
    %c0_i32 = arith.constant 0 : i32
    %c0_i32_0 = arith.constant 0 : i32
    %c0_i32_1 = arith.constant 0 : i32
    return %c0_i32, %c0_i32_0 : i32, i32
  }
  func.func @transform_5(%arg0: i32) -> (i32, i32, i32) {
    %c0_i32 = arith.constant 0 : i32
    %c0_i32_0 = arith.constant 0 : i32
    %c0_i32_1 = arith.constant 0 : i32
    %c0_i32_2 = arith.constant 0 : i32
    return %c0_i32, %c0_i32_0, %c0_i32_1 : i32, i32, i32
  }
  func.func @transform_6(%arg0: i32) -> (i32, i32) {
    %c0_i32 = arith.constant 0 : i32
    %c0_i32_0 = arith.constant 0 : i32
    %c0_i32_1 = arith.constant 0 : i32
    return %c0_i32, %c0_i32_0 : i32, i32
  }
  func.func @transform_7(%arg0: i32) -> (i32, i32) {
    %c0_i32 = arith.constant 0 : i32
    %c0_i32_0 = arith.constant 0 : i32
    %c0_i32_1 = arith.constant 0 : i32
    return %c0_i32, %c0_i32_0 : i32, i32
  }
  func.func @transform_8(%arg0: i32) -> (i32, i32) {
    %c0_i32 = arith.constant 0 : i32
    %c0_i32_0 = arith.constant 0 : i32
    %c0_i32_1 = arith.constant 0 : i32
    return %c0_i32, %c0_i32_0 : i32, i32
  }
  func.func @transform_9(%arg0: i32) -> (i32, i32) {
    %c0_i32 = arith.constant 0 : i32
    %c0_i32_0 = arith.constant 0 : i32
    %c0_i32_1 = arith.constant 0 : i32
    return %c0_i32, %c0_i32_0 : i32, i32
  }
  func.func @transform_10(%arg0: i32) -> (i32, i32) {
    %c0_i32 = arith.constant 0 : i32
    %c0_i32_0 = arith.constant 0 : i32
    return %c0_i32, %arg0 : i32, i32
  }
}

</mosaic_0001>

<bundles_post_ra>
// kernel: tpu_custom_call.1
= control target key start
LH: loop header
LB: loop body
LE: loop exit
PB: predicated region body
PF: predicated region fallthrough
CT: control target
= control target key end

     0   :  { %15 = vsyncpa [#allocation3], 0  ;;  %s1042_s0 = inlined_call_operand.vmem [shape: f32[8,512], index: 0, kind: input, shape index: {}]   ;;  %s1043_s1 = inlined_call_operand.vmem [shape: f32[8,8], index: 1, kind: input, shape index: {}]   ;;  %s1044_s2 = inlined_call_operand.vmem [shape: f32[8,1], index: 2, kind: input, shape index: {}]   ;;  %s1045_s3 = inlined_call_operand.vmem [shape: f32[8,1], index: 3, kind: input, shape index: {}]   ;;  %s1046_s4 = inlined_call_operand.vmem [shape: f32[8,1], index: 4, kind: input, shape index: {}]   ;;  %s1047_s5 = inlined_call_operand.hbm [shape: f32[8,8,512], index: 5, kind: input, shape index: {}]   ;;  %s1048_s6 = inlined_call_operand.vmem [shape: f32[8,1], index: 6, kind: input, shape index: {}]   ;;  %s1049_s7 = inlined_call_operand.vmem [shape: f32[8,1], index: 7, kind: input, shape index: {}]   ;;  %s1050_s8 = inlined_call_operand.vmem [shape: f32[8,8], index: 8, kind: input, shape index: {}]   ;;  %s1051_s9 = inlined_call_operand.vmem [shape: f32[8,1], index: 9, kind: input, shape index: {}]   ;;  %s1052_s10 = inlined_call_operand.hbm [shape: f32[4,512], index: 10, kind: output, shape index: {}]  }
   0x1   :  { %16 = vsyncpa [#allocation4], 0  ;;  %s721_s13 = smov [#allocation2]   ;;  %s673_s17 = scalar_lea.hbm %s1047_s5, 4096 }
   0x2   :  { %s32_s14 = sshll.u32 %s721_s13, 4  ;;  %p674_p0 = scmp.ne.s32.totalorder %s1047_s5, %s673_s17  ;;  %s33_s14 = int_to_ptr.vmem [resolvable:$true] %s32_s14 }
   0x3   :  { %p677_p1 = scmp.lt.u32.totalorder %s673_s17, %s1047_s5 }
   0x5   :  { %p679_p2 = pnand %p677_p1, %p674_p0 }
   0x7   :  { %682 = shalt.err (!%p679_p2)
}
   0x8   :  { %s683_s22 = scalar_lea.vmem %s33_s14, 4096  ;;  %p688_p4 = scmp.lt.s32.totalorder %s33_s14, %s33_s14 }
   0x9   :  { %p684_p3 = scmp.ne.s32.totalorder %s33_s14, %s683_s22  ;;  %p689_p5 = scmp.lt.s32.totalorder %s683_s22, %s683_s22 }
   0xb   :  { %p690_p6 = por %p689_p5, %p688_p4 }
   0xd   :  { %p691_p7 = pnand %p690_p6, %p684_p3 }
   0xf   :  { %694 = shalt.err (!%p691_p7)
}
  0x10   :  { %s722_s23 = smov 512   ;;  %s723_s24 = smov 32  }
  0x11   :  { %38 = dma.hbm_to_vmem [thread:$0]  %s1047_s5, 4096, %s33_s14, [#allocation3], %s722_s23, %s722_s23, %s723_s24  }
  0x12   :  { %717 = dma.done.wait [#allocation3], 4096  }
  0x13   :  { %718 = vsyncadd [#allocation3], 4294963200  ;;  %v724_v0 = vmov 0.0   ;;  %v725_v1 = vmov 0   ;;  %v805_v2 = vld [vmem:[%s1042_s0 + $0x8] sm:$0xff]  ;;  %v810_v3 = vld [vmem:[%s1042_s0 + $0x18] sm:$0xff]  ;;  %v243_v49 = vlaneseq }
  0x14   :  { %129 = vmatprep.mubr.f32.mxu0 %v724_v0  ;;  %200 = vmatprep.mubr.f32.mxu1 %v724_v0  ;;  %v815_v4 = vld [vmem:[%s1042_s0] sm:$0xff]  ;;  %vm61_vm0 = vcmask 64512   ;;  %v822_v5 = vld [vmem:[%s1042_s0 + $0x10] sm:$0xff]  ;;  %s729_s21 = smov 15   ;;  %s730_s22 = smov 1   ;;  %v251_v57 = vld [vmem:[#allocation2 + $0x8] sm:$0xff] }
  0x15   :  { %671 = vset.pattern.permute.xlu0 %v725_v1  ;;  %672 = vset.pattern.permute.xlu1 %v725_v1  ;;  %v54_v6 = vld [vmem:[%s1043_s1] sm:$0xff]  ;;  %s731_s23 = smov 127   ;;  %s732_s24 = smov 113   ;;  %v907_v52 = vand.u32 127, %v243_v49  ;;  %v252_v58 = vld [vmem:[#allocation2 + $0x10] sm:$0xff]  ;;  %v253_v62 = vld [vmem:[#allocation2 + $0x18] sm:$0xff] }
  0x16   :  { %65 = vmatprep.subr.mxu0 %v805_v2  ;;  %136 = vmatprep.subr.mxu1 %v810_v3  ;;  %v55_v7 = vld [vmem:[%s1044_s2] sm:$0xff]  ;;  %s733_s25 = smov 112  }
  0x17   :  { %66 = vmatpush1.msra.mxu0 %v815_v4  ;;  %137 = vmatpush1.msra.mxu1 %v822_v5  ;;  %v225_v8 = vld [vmem:[%s1046_s4] sm:$0xff]  ;;  %s727_s4 = smov 17   ;;  %vm245_vm5 = vcmp.lt.s32.totalorder %v907_v52, 17  ;;  %vm270_vm6 = vcmp.lt.s32.totalorder %v907_v52, 16  ;;  %vm296_vm7 = vcmp.lt.s32.totalorder %v907_v52, 15  ;;  %vm322_vm8 = vcmp.lt.s32.totalorder %v907_v52, 1 }
  0x18   :  { %653 = vmatmul.mubr.msk.f32.vlgmr.msra.gmra.mrb[0].mxu0 %vm61_vm0, %v54_v6  ;;  %654 = vmatmul.mubr.msk.f32.vlgmr.msra.gmra.mrb[0].mxu1 %vm61_vm0, %v54_v6  ;;  %v211_v9 = vld [vmem:[%s1045_s3] sm:$0xff]  ;;  %s726_s3 = smov 111   ;;  %vm348_vm9 = vcmp.lt.s32.totalorder %v907_v52, 127  ;;  %vm374_vm10 = vcmp.lt.s32.totalorder %v907_v52, 113  ;;  %vm400_vm11 = vcmp.lt.s32.totalorder %v907_v52, 112  ;;  %vm426_vm12 = vcmp.lt.s32.totalorder %v907_v52, 111 }
  0x19   :  { %58 = vperm.xlu0 %671, %v55_v7   ;;  %228 = vperm.xlu1 %672, %v225_v8   ;;  %v444_v10 = vld [vmem:[%s1048_s6] sm:$0xff]  ;;  %s728_s6 = smov 16  }
  0x1a   :  { %546 = vmatprep.mubr.f32.mxu0 %v724_v0  ;;  %617 = vmatprep.mubr.f32.mxu1 %v724_v0  ;;  %v458_v29 = vld [vmem:[%s1049_s7] sm:$0xff] }
  0x1b   :  { %v473_v30 = vld [vmem:[%s1051_s9] sm:$0xff] }
  0x1c   :  { %v250_v61 = vld [vmem:[#allocation2] sm:$0xff] }
  0x1d   :  { %214 = vperm.xlu0 %671, %v211_v9   ;;  %447 = vperm.xlu1 %672, %v444_v10  }
  0x98   :  { %v59_v11 = vpop.permute.xlu0 %58  ;;  %v229_v31 = vpop.permute.xlu1 %228 }
  0x9c   :  { %v215_v18 = vpop.permute.xlu0 %214  ;;  %v893_v32 = vpop.permute.xlu1 %447 }
  0xeb   :  { %v131_v12 = vpop.f32.mrb[0].mxu0  ;;  %v202_v13 = vpop.f32.mrb[0].mxu1 }
  0xec   :  { %v132_v14 = vadd.f32 %v131_v12, %v59_v11  ;;  %v203_v15 = vadd.f32 %v202_v13, %v59_v11  ;;  %v133_v16 = vpop.f32.mrb[1].mxu0  ;;  %v204_v17 = vpop.f32.mrb[1].mxu1  ;;  %v278_v12 = vld [vmem:[#allocation2 + $0x30] sm:$0xff] }
  0xed   :  { %v134_v22 = vadd.f32 %v133_v16, %v59_v11  ;;  %v205_v25 = vadd.f32 %v204_v17, %v59_v11  ;;  %v277_v11 = vld [vmem:[#allocation2 + $0x28] sm:$0xff] }
  0xee   :  { %vm207_vm1 = vcmp.ge.f32.partialorder %v132_v14, 0.0  ;;  %v217_v19 = vmul.f32 %v215_v18, %v132_v14  ;;  %v219_v21 = vmul.f32 %v215_v18, %v203_v15  ;;  %vm209_vm2 = vcmp.ge.f32.partialorder %v203_v15, 0.0 }
  0xef   :  { %v218_v24 = vmul.f32 %v215_v18, %v134_v22  ;;  %vm208_vm3 = vcmp.ge.f32.partialorder %v134_v22, 0.0  ;;  %v220_v27 = vmul.f32 %v215_v18, %v205_v25  ;;  %vm210_vm4 = vcmp.ge.f32.partialorder %v205_v25, 0.0  ;;  %v276_v18 = vld [vmem:[#allocation2 + $0x20] sm:$0xff] }
  0xf0   :  { %v843_v20 = vsel %vm207_vm1, %v132_v14, %v217_v19  ;;  %v848_v23 = vsel %vm209_vm2, %v203_v15, %v219_v21  ;;  %v279_v19 = vld [vmem:[#allocation2 + $0x38] sm:$0xff] }
  0xf1   :  { %418 = vrot.lane.b32.xlu0 %v843_v20, %s726_s3  ;;  %235 = vrot.lane.b32.xlu1 %v843_v20, %s727_s4  ;;  %v853_v26 = vsel %vm208_vm3, %v134_v22, %v218_v24  ;;  %v857_v28 = vsel %vm210_vm4, %v205_v25, %v220_v27  ;;  %v231_v1 = vmul.f32 %v229_v31, %v843_v20  ;;  %v303_v25 = vld [vmem:[#allocation2 + $0x48] sm:$0xff] }
  0xf2   :  { %v232_v6 = vmul.f32 %v229_v31, %v853_v26  ;;  %v233_v7 = vmul.f32 %v229_v31, %v848_v23  ;;  %v234_v22 = vmul.f32 %v229_v31, %v857_v28  ;;  %v305_v31 = vld [vmem:[#allocation2 + $0x58] sm:$0xff] }
  0xf5   :  { %422 = vrot.lane.b32.xlu0 %v848_v23, %s726_s3  ;;  %239 = vrot.lane.b32.xlu1 %v848_v23, %s727_s4 }
  0xf9   :  { %237 = vrot.lane.b32.xlu0 %v853_v26, %s727_s4  ;;  %262 = vrot.lane.b32.xlu1 %v843_v20, %s728_s6 }
  0xfd   :  { %241 = vrot.lane.b32.xlu0 %v857_v28, %s727_s4  ;;  %266 = vrot.lane.b32.xlu1 %v848_v23, %s728_s6 }
 0x101   :  { %264 = vrot.lane.b32.xlu0 %v853_v26, %s728_s6  ;;  %288 = vrot.lane.b32.xlu1 %v843_v20, %s729_s21 }
 0x105   :  { %268 = vrot.lane.b32.xlu0 %v857_v28, %s728_s6  ;;  %292 = vrot.lane.b32.xlu1 %v848_v23, %s729_s21 }
 0x109   :  { %290 = vrot.lane.b32.xlu0 %v853_v26, %s729_s21  ;;  %314 = vrot.lane.b32.xlu1 %v843_v20, %s730_s22 }
 0x10d   :  { %294 = vrot.lane.b32.xlu0 %v857_v28, %s729_s21  ;;  %318 = vrot.lane.b32.xlu1 %v848_v23, %s730_s22 }
 0x111   :  { %316 = vrot.lane.b32.xlu0 %v853_v26, %s730_s22  ;;  %340 = vrot.lane.b32.xlu1 %v843_v20, %s731_s23 }
 0x115   :  { %320 = vrot.lane.b32.xlu0 %v857_v28, %s730_s22  ;;  %344 = vrot.lane.b32.xlu1 %v848_v23, %s731_s23 }
 0x119   :  { %342 = vrot.lane.b32.xlu0 %v853_v26, %s731_s23  ;;  %366 = vrot.lane.b32.xlu1 %v843_v20, %s732_s24 }
 0x11d   :  { %346 = vrot.lane.b32.xlu0 %v857_v28, %s731_s23  ;;  %370 = vrot.lane.b32.xlu1 %v848_v23, %s732_s24 }
 0x121   :  { %368 = vrot.lane.b32.xlu0 %v853_v26, %s732_s24  ;;  %392 = vrot.lane.b32.xlu1 %v843_v20, %s733_s25 }
 0x125   :  { %372 = vrot.lane.b32.xlu0 %v857_v28, %s732_s24  ;;  %396 = vrot.lane.b32.xlu1 %v848_v23, %s733_s25 }
 0x129   :  { %394 = vrot.lane.b32.xlu0 %v853_v26, %s733_s25  ;;  %420 = vrot.lane.b32.xlu1 %v853_v26, %s726_s3  ;;  %v304_v26 = vld [vmem:[#allocation2 + $0x50] sm:$0xff] }
 0x12d   :  { %398 = vrot.lane.b32.xlu0 %v857_v28, %s733_s25  ;;  %424 = vrot.lane.b32.xlu1 %v857_v28, %s726_s3  ;;  %v302_v28 = vld [vmem:[#allocation2 + $0x40] sm:$0xff] }
 0x131   :  { %461 = vperm.xlu0 %671, %v458_v29   ;;  %476 = vperm.xlu1 %672, %v473_v30  }
 0x163   :  { %v895_v33 = vpop.permute.xlu0 %418  ;;  %v236_v34 = vpop.permute.xlu1 %235 }
 0x167   :  { %v897_v35 = vpop.permute.xlu0 %422  ;;  %v240_v36 = vpop.permute.xlu1 %239 }
 0x16b   :  { %v238_v37 = vpop.permute.xlu0 %237  ;;  %v263_v38 = vpop.permute.xlu1 %262 }
 0x16c   :  { %v247_v59 = vsel %vm245_vm5, %v238_v37, %v240_v36  ;;  %v248_v60 = vsel %vm245_vm5, %v236_v34, %v238_v37 }
 0x16d   :  { %v255_v9 = vmul.f32 %v251_v57, %v248_v60  ;;  %v256_v10 = vmul.f32 %v252_v58, %v247_v59  ;;  %v329_v58 = vld [vmem:[#allocation2 + $0x68] sm:$0xff]  ;;  %v330_v59 = vld [vmem:[#allocation2 + $0x70] sm:$0xff] }
 0x16f   :  { %v242_v39 = vpop.permute.xlu0 %241  ;;  %v267_v40 = vpop.permute.xlu1 %266 }
 0x170   :  { %v246_v63 = vsel %vm245_vm5, %v240_v36, %v242_v39  ;;  %v249_v0 = vsel %vm245_vm5, %v242_v39, %v236_v34 }
 0x171   :  { %v254_v16 = vmul.f32 %v250_v61, %v249_v0  ;;  %v257_v17 = vmul.f32 %v253_v62, %v246_v63  ;;  %v328_v61 = vld [vmem:[#allocation2 + $0x60] sm:$0xff]  ;;  %v331_v62 = vld [vmem:[#allocation2 + $0x78] sm:$0xff] }
 0x173   :  { %v265_v41 = vpop.permute.xlu0 %264  ;;  %v289_v42 = vpop.permute.xlu1 %288  ;;  %v261_v49 = vadd.f32 %v257_v17, %v234_v22  ;;  %v356_v17 = vld [vmem:[#allocation2 + $0x90] sm:$0xff] }
 0x174   :  { %v272_v13 = vsel %vm270_vm6, %v265_v41, %v267_v40  ;;  %v273_v14 = vsel %vm270_vm6, %v263_v38, %v265_v41  ;;  %v260_v41 = vadd.f32 %v256_v10, %v233_v7 }
 0x175   :  { %v281_v23 = vmul.f32 %v277_v11, %v273_v14  ;;  %v282_v24 = vmul.f32 %v278_v12, %v272_v13  ;;  %v354_v13 = vld [vmem:[#allocation2 + $0x80] sm:$0xff]  ;;  %v355_v14 = vld [vmem:[#allocation2 + $0x88] sm:$0xff] }
 0x177   :  { %v269_v43 = vpop.permute.xlu0 %268  ;;  %v293_v44 = vpop.permute.xlu1 %292  ;;  %v286_v7 = vadd.f32 %v282_v24, %v260_v41 }
 0x178   :  { %v271_v20 = vsel %vm270_vm6, %v267_v40, %v269_v43  ;;  %v274_v21 = vsel %vm270_vm6, %v269_v43, %v263_v38  ;;  %v259_v40 = vadd.f32 %v255_v9, %v232_v6  ;;  %v258_v43 = vadd.f32 %v254_v16, %v231_v1 }
 0x179   :  { %v280_v34 = vmul.f32 %v276_v18, %v274_v21  ;;  %v283_v36 = vmul.f32 %v279_v19, %v271_v20  ;;  %v357_v18 = vld [vmem:[#allocation2 + $0x98] sm:$0xff] }
 0x17a   :  { %v285_v6 = vadd.f32 %v281_v23, %v259_v40 }
 0x17b   :  { %v291_v45 = vpop.permute.xlu0 %290  ;;  %v899_v46 = vpop.permute.xlu1 %314  ;;  %v284_v9 = vadd.f32 %v280_v34, %v258_v43  ;;  %v287_v10 = vadd.f32 %v283_v36, %v261_v49 }
 0x17c   :  { %v298_v27 = vsel %vm296_vm7, %v291_v45, %v293_v44  ;;  %v299_v29 = vsel %vm296_vm7, %v289_v42, %v291_v45 }
 0x17d   :  { %v307_v45 = vmul.f32 %v303_v25, %v299_v29  ;;  %v308_v57 = vmul.f32 %v304_v26, %v298_v27  ;;  %v380_v27 = vld [vmem:[#allocation2 + $0xa0] sm:$0xff]  ;;  %v381_v29 = vld [vmem:[#allocation2 + $0xa8] sm:$0xff] }
 0x17f   :  { %v295_v47 = vpop.permute.xlu0 %294  ;;  %v901_v48 = vpop.permute.xlu1 %318  ;;  %v311_v21 = vadd.f32 %v307_v45, %v285_v6  ;;  %v312_v22 = vadd.f32 %v308_v57, %v286_v7  ;;  %v406_v45 = vld [vmem:[#allocation2 + $0xc0] sm:$0xff] }
 0x180   :  { %v297_v37 = vsel %vm296_vm7, %v293_v44, %v295_v47  ;;  %v300_v38 = vsel %vm296_vm7, %v295_v47, %v289_v42 }
 0x181   :  { %v306_v47 = vmul.f32 %v302_v28, %v300_v38  ;;  %v309_v60 = vmul.f32 %v305_v31, %v297_v37  ;;  %v382_v28 = vld [vmem:[#allocation2 + $0xb0] sm:$0xff]  ;;  %v383_v31 = vld [vmem:[#allocation2 + $0xb8] sm:$0xff] }
 0x183   :  { %v903_v50 = vpop.permute.xlu0 %316  ;;  %v905_v51 = vpop.permute.xlu1 %340  ;;  %v310_v23 = vadd.f32 %v306_v47, %v284_v9 }
 0x184   :  { %v324_v44 = vsel %vm322_vm8, %v903_v50, %v901_v48  ;;  %v325_v42 = vsel %vm322_vm8, %v899_v46, %v903_v50 }
 0x185   :  { %v333_v11 = vmul.f32 %v329_v58, %v325_v42  ;;  %v334_v12 = vmul.f32 %v330_v59, %v324_v44  ;;  %v407_v58 = vld [vmem:[#allocation2 + $0xc8] sm:$0xff]  ;;  %v409_v42 = vld [vmem:[#allocation2 + $0xd8] sm:$0xff] }
 0x187   :  { %v909_v53 = vpop.permute.xlu0 %320  ;;  %v911_v54 = vpop.permute.xlu1 %344  ;;  %v337_v40 = vadd.f32 %v333_v11, %v311_v21  ;;  %v338_v41 = vadd.f32 %v334_v12, %v312_v22 }
 0x188   :  { %v323_v63 = vsel %vm322_vm8, %v901_v48, %v909_v53  ;;  %v326_v0 = vsel %vm322_vm8, %v909_v53, %v899_v46 }
 0x189   :  { %v332_v53 = vmul.f32 %v328_v61, %v326_v0  ;;  %v335_v16 = vmul.f32 %v331_v62, %v323_v63 }
 0x18b   :  { %v914_v55 = vpop.permute.xlu0 %342  ;;  %v916_v56 = vpop.permute.xlu1 %366  ;;  %v336_v43 = vadd.f32 %v332_v53, %v310_v23  ;;  %v432_v53 = vld [vmem:[#allocation2 + $0xe0] sm:$0xff] }
 0x18c   :  { %v350_v48 = vsel %vm348_vm9, %v914_v55, %v911_v54  ;;  %v351_v46 = vsel %vm348_vm9, %v905_v51, %v914_v55  ;;  %v313_v55 = vadd.f32 %v309_v60, %v287_v10 }
 0x18d   :  { %v358_v25 = vmul.f32 %v354_v13, %v351_v46  ;;  %v359_v26 = vmul.f32 %v355_v14, %v350_v48 }
 0x18e   :  { %v339_v49 = vadd.f32 %v335_v16, %v313_v55  ;;  %v433_v16 = vld [vmem:[#allocation2 + $0xe8] sm:$0xff] }
 0x18f   :  { %v923_v8 = vpop.permute.xlu0 %346  ;;  %v929_v15 = vpop.permute.xlu1 %370  ;;  %v362_v63 = vadd.f32 %v358_v25, %v336_v43  ;;  %v363_v0 = vadd.f32 %v359_v26, %v337_v40 }
 0x190   :  { %v349_v19 = vsel %vm348_vm9, %v911_v54, %v923_v8  ;;  %v352_v20 = vsel %vm348_vm9, %v923_v8, %v905_v51 }
 0x191   :  { %v360_v8 = vmul.f32 %v356_v17, %v349_v19  ;;  %v361_v36 = vmul.f32 %v357_v18, %v352_v20  ;;  %v434_v17 = vld [vmem:[#allocation2 + $0xf0] sm:$0xff]  ;;  %v435_v18 = vld [vmem:[#allocation2 + $0xf8] sm:$0xff] }
 0x193   :  { %v369_v30 = vpop.permute.xlu0 %368  ;;  %v947_v39 = vpop.permute.xlu1 %392  ;;  %v365_v6 = vadd.f32 %v361_v36, %v339_v49 }
 0x194   :  { %v376_v54 = vsel %vm374_vm10, %v369_v30, %v929_v15  ;;  %v377_v34 = vsel %vm374_vm10, %v916_v56, %v369_v30 }
 0x195   :  { %v384_v57 = vmul.f32 %v380_v27, %v377_v34  ;;  %v385_v30 = vmul.f32 %v381_v29, %v376_v54 }
 0x197   :  { %v373_v1 = vpop.permute.xlu0 %372  ;;  %v397_v50 = vpop.permute.xlu1 %396  ;;  %v388_v13 = vadd.f32 %v384_v57, %v362_v63  ;;  %v389_v14 = vadd.f32 %v385_v30, %v363_v0 }
 0x198   :  { %v375_v37 = vsel %vm374_vm10, %v929_v15, %v373_v1  ;;  %v378_v38 = vsel %vm374_vm10, %v373_v1, %v916_v56  ;;  %v408_v15 = vld [vmem:[#allocation2 + $0xd0] sm:$0xff]  ;;  %v364_v1 = vadd.f32 %v360_v8, %v338_v41 }
 0x199   :  { %v386_v60 = vmul.f32 %v382_v28, %v375_v37  ;;  %v387_v56 = vmul.f32 %v383_v31, %v378_v38 }
 0x19b   :  { %v395_v24 = vpop.permute.xlu0 %394  ;;  %v421_v51 = vpop.permute.xlu1 %420  ;;  %v390_v48 = vadd.f32 %v386_v60, %v364_v1  ;;  %v391_v46 = vadd.f32 %v387_v56, %v365_v6 }
 0x19c   :  { %v402_v59 = vsel %vm400_vm11, %v395_v24, %v397_v50  ;;  %v403_v44 = vsel %vm400_vm11, %v947_v39, %v395_v24 }
 0x19d   :  { %v410_v7 = vmul.f32 %v406_v45, %v403_v44  ;;  %v411_v9 = vmul.f32 %v407_v58, %v402_v59  ;;  %v472_v45 = vld [vmem:[%s1050_s8] sm:$0xff]  ;;  %s734_s8 = smov [#allocation5]  }
 0x19e   :  { %s644_s30 = sshll.u32 %s734_s8, 4  ;;  %s645_s30 = int_to_ptr.vmem [resolvable:$true] %s644_s30 }
 0x19f   :  { %v399_v47 = vpop.permute.xlu0 %398  ;;  %v425_v12 = vpop.permute.xlu1 %424  ;;  %v414_v21 = vadd.f32 %v410_v7, %v388_v13  ;;  %v415_v22 = vadd.f32 %v411_v9, %v389_v14  ;;  %s695_s11 = scalar_lea.vmem %s645_s30, 256  ;;  %p700_p9 = scmp.lt.s32.totalorder %s645_s30, %s645_s30 }
 0x1a0   :  { %v401_v61 = vsel %vm400_vm11, %v397_v50, %v399_v47  ;;  %v404_v62 = vsel %vm400_vm11, %v399_v47, %v947_v39  ;;  %v428_v50 = vsel %vm426_vm12, %v421_v51, %v897_v35  ;;  %v429_v39 = vsel %vm426_vm12, %v895_v33, %v421_v51  ;;  %p696_p8 = scmp.ne.s32.totalorder %s645_s30, %s695_s11  ;;  %p701_p10 = scmp.lt.s32.totalorder %s695_s11, %s695_s11 }
 0x1a1   :  { %v412_v10 = vmul.f32 %v408_v15, %v401_v61  ;;  %v413_v11 = vmul.f32 %v409_v42, %v404_v62  ;;  %v427_v19 = vsel %vm426_vm12, %v897_v35, %v425_v12  ;;  %v430_v20 = vsel %vm426_vm12, %v425_v12, %v895_v33 }
 0x1a2   :  { %v436_v24 = vmul.f32 %v432_v53, %v429_v39  ;;  %v437_v25 = vmul.f32 %v433_v16, %v428_v50  ;;  %v438_v26 = vmul.f32 %v434_v17, %v427_v19  ;;  %v439_v27 = vmul.f32 %v435_v18, %v430_v20  ;;  %p702_p11 = por %p701_p10, %p700_p9 }
 0x1a3   :  { %v416_v23 = vadd.f32 %v412_v10, %v390_v48  ;;  %v417_v55 = vadd.f32 %v413_v11, %v391_v46 }
 0x1a4   :  { %v440_v29 = vadd.f32 %v436_v24, %v414_v21  ;;  %v441_v54 = vadd.f32 %v437_v25, %v415_v22  ;;  %p703_p12 = pnand %p702_p11, %p696_p8 }
 0x1a5   :  { %v442_v34 = vadd.f32 %v438_v26, %v416_v23  ;;  %v443_v51 = vadd.f32 %v439_v27, %v417_v55 }
 0x1a6   :  { %v450_v8 = vadd.f32 %v893_v32, %v440_v29  ;;  %v451_v35 = vadd.f32 %v893_v32, %v441_v54 }
 0x1a7   :  { %v452_v36 = vadd.f32 %v893_v32, %v442_v34  ;;  %v453_v33 = vadd.f32 %v893_v32, %v443_v51 }
 0x1a8   :  { %vm455_vm13 = vcmp.ge.f32.partialorder %v451_v35, 0.0  ;;  %vm454_vm15 = vcmp.ge.f32.partialorder %v450_v8, 0.0 }
 0x1a9   :  { %vm457_vm14 = vcmp.ge.f32.partialorder %v453_v33, 0.0  ;;  %vm456_vm1 = vcmp.ge.f32.partialorder %v452_v36, 0.0 }
 0x1b0   :  { %v462_v52 = vpop.permute.xlu0 %461  ;;  %v477_v32 = vpop.permute.xlu1 %476 }
 0x1b1   :  { %v464_v28 = vmul.f32 %v462_v52, %v450_v8  ;;  %v465_v31 = vmul.f32 %v462_v52, %v451_v35  ;;  %v466_v37 = vmul.f32 %v462_v52, %v452_v36  ;;  %v467_v38 = vmul.f32 %v462_v52, %v453_v33 }
 0x1b3   :  { %v469_v40 = vsel %vm455_vm13, %v451_v35, %v465_v31  ;;  %v471_v41 = vsel %vm457_vm14, %v453_v33, %v467_v38  ;;  %v468_v43 = vsel %vm454_vm15, %v450_v8, %v464_v28  ;;  %v470_v49 = vsel %vm456_vm1, %v452_v36, %v466_v37 }
 0x1b4   :  { %482 = vmatprep.subr.mxu0 %v469_v40  ;;  %553 = vmatprep.subr.mxu1 %v471_v41 }
 0x1b5   :  { %483 = vmatpush1.msra.mxu0 %v468_v43  ;;  %554 = vmatpush1.msra.mxu1 %v470_v49 }
 0x1b6   :  { %655 = vmatmul.mubr.msk.f32.vlgmr.msra.gmra.mrb[2].mxu0 %vm61_vm0, %v472_v45  ;;  %656 = vmatmul.mubr.msk.f32.vlgmr.msra.gmra.mrb[2].mxu1 %vm61_vm0, %v472_v45 }
 0x289   :  { %v548_v57 = vpop.f32.mrb[2].mxu0  ;;  %v619_v30 = vpop.f32.mrb[2].mxu1 }
 0x28a   :  { %v549_v58 = vadd.f32 %v548_v57, %v477_v32  ;;  %v620_v59 = vadd.f32 %v619_v30, %v477_v32  ;;  %v550_v44 = vpop.f32.mrb[3].mxu0  ;;  %v621_v15 = vpop.f32.mrb[3].mxu1 }
 0x28b   :  { %v551_v42 = vadd.f32 %v550_v44, %v477_v32  ;;  %v622_v47 = vadd.f32 %v621_v15, %v477_v32 }
 0x28c   :  { %v624_v60 = vadd.f32 %v549_v58, %v815_v4  ;;  %v626_v56 = vadd.f32 %v620_v59, %v822_v5 }
 0x28d   :  { %v625_v61 = vadd.f32 %v551_v42, %v805_v2  ;;  %v627_v62 = vadd.f32 %v622_v47, %v810_v3 }
 0x28f   :  { %v632_v63 = vcombine.low %v624_v60, %v625_v61  ;;  %v633_v0 = vcombine.low %v626_v56, %v627_v62 }
 0x291   :  { %636 = vst [vmem:[#allocation5] sm:$0xff] %v632_v63  ;;  %637 = vst [vmem:[#allocation5 + $0x8] sm:$0xff] %v633_v0 }
 0x292   :  { %706 = shalt.err (!%p703_p12)
}
 0x293   :  { %s707_s13 = scalar_lea.hbm %s1052_s10, 256 }
 0x294   :  { %p708_p13 = scmp.ne.s32.totalorder %s1052_s10, %s707_s13  ;;  %p711_p0 = scmp.lt.u32.totalorder %s707_s13, %s1052_s10 }
 0x296   :  { %p713_p1 = pnand %p711_p0, %p708_p13 }
 0x298   :  { %716 = shalt.err (!%p713_p1)
}
 0x299   :  { %647 = dma.vmem_to_hbm [thread:$0]  %s645_s30, 256, %s1052_s10, [#allocation4]  }
 0x29a   :  { %719 = dma.done.wait [#allocation4], 256  }
 0x29b   :  { %720 = vsyncadd [#allocation4], 4294967040 }
 0x29c   :  { %651 = vsyncpa [#allocation3], 1 }
 0x29d   :  { %652 = vsyncpa [#allocation4], 1 }

</bundles_post_ra>
